<compile_context>
chip_gen: v7x
topology: tpu7x:2x2x1
jax: 0.10.0
libtpu: 0.0.40
codegen_flags: <defaults>
</compile_context>

<pallas_src>
import numpy as np
import jax
import jax.numpy as jnp
from jax.experimental import pallas as pl
from jax.experimental.pallas import tpu as pltpu

NEGATIVE_SLOPE = 1.0
IN_FEATURES = 256
OUT_FEATURES = 512


def linear_leaky_kernel(x_ref, w_ref, b_ref, o_ref):
    # x_ref: (TB, 256) f32, w_ref: (256, 512) f32/bf16, b_ref: (1, 512) f32,
    # o_ref: (TB, 512) f32/bf16.
    x = x_ref[...]
    w = w_ref[...]
    if x.dtype != w.dtype:
        # In-VMEM cast (zero extra HBM traffic) so the MXU runs at bf16 rate.
        x = x.astype(w.dtype)
    acc = jnp.dot(x, w, preferred_element_type=jnp.float32)
    acc = acc + b_ref[...].astype(jnp.float32)
    if NEGATIVE_SLOPE != 1.0:  # static: with slope == 1 the select is identity
        acc = jnp.where(acc > 0, acc, acc * NEGATIVE_SLOPE)
    o_ref[...] = acc.astype(o_ref.dtype)


def prepare_params(weight, bias, *, cast_weight_to_bf16=False):
    """One-time layout prep (call OUTSIDE the hot/jitted path).

    weight: (512, 256) PyTorch Linear layout -> (256, 512) [optionally bf16]
    bias:   (512,)                            -> (1, 512) f32
    """
    w_t = weight.T
    if cast_weight_to_bf16:
        w_t = w_t.astype(jnp.bfloat16)
    return w_t, bias.reshape(1, OUT_FEATURES).astype(jnp.float32)


def _tpu_generation():
    try:
        kind = jax.devices()[0].device_kind.lower()
    except Exception:
        return None
    for tag in ("v7", "v6", "v5"):
        if tag in kind:
            return tag
    return None


def _round_up(v, m):
    return ((v + m - 1) // m) * m


def _pick_tile_b(batch, gen, align):
    if gen == "v5":
        tile = 1024          # fits comfortably in v5e's 16 MiB scoped VMEM
    elif gen in ("v6", "v7"):
        tile = 2048          # fewer, fatter steps; amortizes per-step overhead
    else:
        tile = 512
    tile = min(tile, _round_up(batch, align))
    tile = max(align, (tile // align) * align)
    if gen == "v7" and batch > align:
        # v7x has 2 TensorCores per chip: force >= 2 "parallel" grid steps.
        half = _round_up(pl.cdiv(batch, 2), align)
        tile = max(align, min(tile, half))
    return tile


def linear_leaky(x, w_t, b2d, *, tile_b=None, out_dtype=jnp.float32):
    """x: (B, 256) f32, w_t: (256, 512) f32/bf16, b2d: (1, 512) f32 -> (B, 512)."""
    B, K = x.shape
    assert K == IN_FEATURES
    assert w_t.shape == (IN_FEATURES, OUT_FEATURES)
    assert b2d.shape == (1, OUT_FEATURES)

    gen = _tpu_generation()
    out_dt = np.dtype(out_dtype)
    bf16_involved = (w_t.dtype == jnp.bfloat16) or (out_dt == np.dtype(jnp.bfloat16))
    align = 16 if bf16_involved else 8

    if tile_b is None:
        tile_b = _pick_tile_b(B, gen, align)
    else:
        tile_b = max(align, (min(tile_b, _round_up(B, align)) // align) * align)

    grid = (pl.cdiv(B, tile_b),)

    x_bytes = x.dtype.itemsize
    w_bytes = w_t.dtype.itemsize
    o_bytes = out_dt.itemsize

    # Double-buffered x/out tiles + (double-buffered) resident weight/bias.
    vmem_need = (2 * tile_b * IN_FEATURES * x_bytes
                 + 2 * tile_b * OUT_FEATURES * o_bytes
                 + 2 * IN_FEATURES * OUT_FEATURES * w_bytes
                 + 2 * OUT_FEATURES * 4)
    vmem_limit = int(min(max(32 << 20, vmem_need + (8 << 20)), 48 << 20))

    cost = pl.CostEstimate(
        flops=2 * B * IN_FEATURES * OUT_FEATURES,
        transcendentals=0,
        bytes_accessed=(B * IN_FEATURES * x_bytes
                        + IN_FEATURES * OUT_FEATURES * w_bytes
                        + OUT_FEATURES * 4
                        + B * OUT_FEATURES * o_bytes),
    )

    return pl.pallas_call(
        linear_leaky_kernel,
        out_shape=jax.ShapeDtypeStruct((B, OUT_FEATURES), out_dtype),
        grid_spec=pltpu.PrefetchScalarGridSpec(
            num_scalar_prefetch=0,
            grid=grid,
            in_specs=[
                pl.BlockSpec((tile_b, IN_FEATURES), lambda i: (i, 0)),
                # Weight & bias resident across the whole grid (constant index).
                pl.BlockSpec((IN_FEATURES, OUT_FEATURES), lambda i: (0, 0)),
                pl.BlockSpec((1, OUT_FEATURES), lambda i: (0, 0)),
            ],
            out_specs=pl.BlockSpec((tile_b, OUT_FEATURES), lambda i: (i, 0)),
        ),
        compiler_params=pltpu.CompilerParams(
            dimension_semantics=("parallel",),
            vmem_limit_bytes=vmem_limit,
        ),
        cost_estimate=cost,
    )(x, w_t, b2d)


if __name__ == "__main__":
    key = jax.random.PRNGKey(0)
    kx, kw, kb = jax.random.split(key, 3)

    # Small batch of feature vectors consistent with Linear(256, 512).
    B = 64
    x = jax.random.normal(kx, (B, IN_FEATURES), dtype=jnp.float32)

    # Deterministic init mimicking PyTorch Linear uniform(-1/sqrt(in), 1/sqrt(in)).
    bound = 1.0 / (IN_FEATURES ** 0.5)
    weight = jax.random.uniform(kw, (OUT_FEATURES, IN_FEATURES),
                                minval=-bound, maxval=bound, dtype=jnp.float32)
    bias = jax.random.uniform(kb, (OUT_FEATURES,),
                              minval=-bound, maxval=bound, dtype=jnp.float32)

    # Reference in plain JAX (full module semantics, including the select).
    v1 = x @ weight.T + bias
    ref = jnp.where(v1 > 0, v1, v1 * NEGATIVE_SLOPE)

    # 1) Exact f32 path (default).
    w_t, b2d = prepare_params(weight, bias)
    out = jax.block_until_ready(linear_leaky(x, w_t, b2d))
    assert out.shape == (B, OUT_FEATURES)
    assert jnp.allclose(out, ref, atol=1e-4, rtol=1e-5)

    # 2) bf16-weight fast path (in-kernel x cast, f32 accumulate) — looser tol.
    w_t_bf16, b2d = prepare_params(weight, bias, cast_weight_to_bf16=True)
    out_bf = jax.block_until_ready(linear_leaky(x, w_t_bf16, b2d))
    assert out_bf.shape == (B, OUT_FEATURES)
    assert jnp.allclose(out_bf, ref, atol=1e-1, rtol=1e-2)

    print("KERNEL_OK")
</pallas_src>

<mosaic_0001>
module attributes {stable_mosaic.version = 11 : i64} {
  func.func @linear_leaky_kernel(%arg0: i32, %arg1: memref<64x256xf32, #tpu.memory_space<vmem>>, %arg2: memref<256x512xf32, #tpu.memory_space<vmem>>, %arg3: memref<1x512xf32, #tpu.memory_space<vmem>>, %arg4: memref<64x512xf32, #tpu.memory_space<vmem>>) attributes {dimension_semantics = [#tpu.dimension_semantics<parallel>], iteration_bounds = array<i64: 1>, scalar_prefetch = 0 : i64, scratch_operands = 0 : i64, tpu.core_type = #tpu.core_type<tc>, window_params = [{transform_indices = @transform_0, window_bounds = array<i64: 64, 256>}, {pipeline_mode = #tpu.pipeline_mode<synchronous>, transform_indices = @transform_1, window_bounds = array<i64: 256, 512>}, {pipeline_mode = #tpu.pipeline_mode<synchronous>, transform_indices = @transform_2, window_bounds = array<i64: 1, 512>}, {transform_indices = @transform_3, window_bounds = array<i64: 64, 512>}]} {
    %c0 = arith.constant 0 : index
    %c0_0 = arith.constant 0 : index
    %0 = vector.load %arg1[%c0, %c0_0] : memref<64x256xf32, #tpu.memory_space<vmem>>, vector<64x256xf32>
    %c0_1 = arith.constant 0 : index
    %c0_2 = arith.constant 0 : index
    %1 = vector.load %arg2[%c0_1, %c0_2] : memref<256x512xf32, #tpu.memory_space<vmem>>, vector<256x512xf32>
    %cst = arith.constant dense<0.000000e+00> : vector<64x512xf32>
    %2 = tpu.matmul %0, %1, %cst {dimension_numbers = #tpu.dot_dimension_numbers<[1], [0], [0], [1], [0, 0, 1, 1], [], []>} : vector<64x256xf32>, vector<256x512xf32>, vector<64x512xf32> -> vector<64x512xf32>
    %c0_3 = arith.constant 0 : index
    %c0_4 = arith.constant 0 : index
    %3 = vector.load %arg3[%c0_3, %c0_4] : memref<1x512xf32, #tpu.memory_space<vmem>>, vector<1x512xf32>
    %4 = vector.broadcast %3 : vector<1x512xf32> to vector<64x512xf32>
    %5 = arith.addf %2, %4 : vector<64x512xf32>
    %c0_5 = arith.constant 0 : index
    %c0_6 = arith.constant 0 : index
    %6 = vector.load %arg4[%c0_5, %c0_6] : memref<64x512xf32, #tpu.memory_space<vmem>>, vector<64x512xf32>
    tpu.vector_store %arg4[%c0_5, %c0_6], %5 {strides = array<i32>} : memref<64x512xf32, #tpu.memory_space<vmem>>, vector<64x512xf32>,
    return
  }
  func.func @transform_0(%arg0: i32) -> (i32, i32) {
    %c0_i32 = arith.constant 0 : i32
    %c0_i32_0 = arith.constant 0 : i32
    return %arg0, %c0_i32 : i32, i32
  }
  func.func @transform_1(%arg0: i32) -> (i32, i32) {
    %c0_i32 = arith.constant 0 : i32
    %c0_i32_0 = arith.constant 0 : i32
    %c0_i32_1 = arith.constant 0 : i32
    return %c0_i32, %c0_i32_0 : i32, i32
  }
  func.func @transform_2(%arg0: i32) -> (i32, i32) {
    %c0_i32 = arith.constant 0 : i32
    %c0_i32_0 = arith.constant 0 : i32
    %c0_i32_1 = arith.constant 0 : i32
    return %c0_i32, %c0_i32_0 : i32, i32
  }
  func.func @transform_3(%arg0: i32) -> (i32, i32) {
    %c0_i32 = arith.constant 0 : i32
    %c0_i32_0 = arith.constant 0 : i32
    return %arg0, %c0_i32 : i32, i32
  }
}

</mosaic_0001>

<bundles_post_ra>
// kernel: tpu_custom_call.1
= control target key start
LH: loop header
LB: loop body
LE: loop exit
PB: predicated region body
PF: predicated region fallthrough
CT: control target
= control target key end

     0   :  { %8 = vsyncpa [#allocation3], 0  ;;  %s804_s0 = inlined_call_operand.hbm [shape: f32[64,256], index: 0, kind: input, shape index: {}]   ;;  %s805_s1 = inlined_call_operand.hbm [shape: f32[256,512], index: 1, kind: input, shape index: {}]   ;;  %s806_s2 = inlined_call_operand.vmem [shape: f32[1,512], index: 2, kind: input, shape index: {}]   ;;  %s807_s3 = inlined_call_operand.hbm [shape: f32[64,512], index: 3, kind: output, shape index: {}]  }
   0x1   :  { %9 = vsyncpa [#allocation6], 0 }
   0x2   :  { %10 = vsyncpa [#allocation4], 0  ;;  %s692_s12 = smov [#allocation2]   ;;  %s620_s16 = scalar_lea.hbm %s804_s0, 2048 }
   0x3   :  { %s16_s13 = sshll.u32 %s692_s12, 4  ;;  %p621_p0 = scmp.ne.s32.totalorder %s804_s0, %s620_s16  ;;  %s17_s13 = int_to_ptr.vmem [resolvable:$true] %s16_s13 }
   0x4   :  { %p624_p1 = scmp.lt.u32.totalorder %s620_s16, %s804_s0 }
   0x6   :  { %p626_p2 = pnand %p624_p1, %p621_p0 }
   0x8   :  { %629 = shalt.err (!%p626_p2)
}
   0x9   :  { %s630_s21 = scalar_lea.vmem %s17_s13, 2048  ;;  %p635_p4 = scmp.lt.s32.totalorder %s17_s13, %s17_s13 }
   0xa   :  { %p631_p3 = scmp.ne.s32.totalorder %s17_s13, %s630_s21  ;;  %p636_p5 = scmp.lt.s32.totalorder %s630_s21, %s630_s21 }
   0xc   :  { %p637_p6 = por %p636_p5, %p635_p4 }
   0xe   :  { %p638_p7 = pnand %p637_p6, %p631_p3 }
  0x10   :  { %641 = shalt.err (!%p638_p7)
}
  0x11   :  { %s693_s22 = smov 256   ;;  %s694_s23 = smov 16  }
  0x12   :  { %22 = dma.hbm_to_vmem [thread:$0]  %s804_s0, 2048, %s17_s13, [#allocation3], %s693_s22, %s693_s22, %s694_s23  }
  0x13   :  { %s695_s26 = smov [#allocation5]   ;;  %s642_s30 = scalar_lea.hbm %s805_s1, 16384 }
  0x14   :  { %s28_s27 = sshll.u32 %s695_s26, 4  ;;  %p643_p8 = scmp.ne.s32.totalorder %s805_s1, %s642_s30  ;;  %s29_s27 = int_to_ptr.vmem [resolvable:$true] %s28_s27 }
  0x15   :  { %p646_p9 = scmp.lt.u32.totalorder %s642_s30, %s805_s1 }
  0x17   :  { %p648_p10 = pnand %p646_p9, %p643_p8 }
  0x19   :  { %651 = shalt.err (!%p648_p10)
}
  0x1a   :  { %s652_s8 = scalar_lea.vmem %s29_s27, 16384  ;;  %p657_p12 = scmp.lt.s32.totalorder %s29_s27, %s29_s27 }
  0x1b   :  { %p653_p11 = scmp.ne.s32.totalorder %s29_s27, %s652_s8  ;;  %p658_p13 = scmp.lt.s32.totalorder %s652_s8, %s652_s8 }
  0x1d   :  { %p659_p0 = por %p658_p13, %p657_p12 }
  0x1f   :  { %p660_p1 = pnand %p659_p0, %p653_p11 }
  0x21   :  { %663 = shalt.err (!%p660_p1)
}
  0x22   :  { %s696_s0 = smov 512   ;;  %s697_s9 = smov 32  }
  0x23   :  { %34 = dma.hbm_to_vmem [thread:$0]  %s805_s1, 16384, %s29_s27, [#allocation6], %s696_s0, %s696_s0, %s697_s9  }
  0x24   :  { %686 = dma.done.wait [#allocation3], 2048  }
  0x25   :  { %687 = vsyncadd [#allocation3], 4294965248 }
  0x26   :  { %688 = dma.done.wait [#allocation6], 16384  }
  0x27   :  { %689 = vsyncadd [#allocation6], 4294950912  ;;  %v60_v0 = vld [vmem:[#allocation5 + $0x8] sm:$0xff]  ;;  %v62_v2 = vld [vmem:[#allocation5 + $0x18] sm:$0xff] }
  0x28   :  { %v64_v1 = vld [vmem:[#allocation5 + $0x28] sm:$0xff]  ;;  %v66_v4 = vld [vmem:[#allocation5 + $0x38] sm:$0xff]  ;;  %v59_v5 = vld [vmem:[#allocation5] sm:$0xff] }
  0x29   :  { %v485_v3 = vpack.c.bf16 %v64_v1, %v60_v0  ;;  %v63_v6 = vld [vmem:[#allocation5 + $0x20] sm:$0xff]  ;;  %v549_v7 = vpack.c.bf16 %v66_v4, %v62_v2  ;;  %v61_v9 = vld [vmem:[#allocation5 + $0x10] sm:$0xff]  ;;  %v68_v11 = vld [vmem:[#allocation5 + $0x48] sm:$0xff] }
  0x2a   :  { %v487_v8 = vpack.c.bf16 %v63_v6, %v59_v5  ;;  %v65_v10 = vld [vmem:[#allocation5 + $0x30] sm:$0xff]  ;;  %v72_v13 = vld [vmem:[#allocation5 + $0x68] sm:$0xff]  ;;  %v70_v14 = vld [vmem:[#allocation5 + $0x58] sm:$0xff] }
  0x2b   :  { %486 = vmatprep.subr.bf16.mxu0 %v485_v3  ;;  %v551_v12 = vpack.c.bf16 %v65_v10, %v61_v9  ;;  %v74_v15 = vld [vmem:[#allocation5 + $0x78] sm:$0xff]  ;;  %550 = vmatprep.subr.bf16.mxu1 %v549_v7  ;;  %v489_v16 = vpack.c.bf16 %v72_v13, %v68_v11  ;;  %v67_v18 = vld [vmem:[#allocation5 + $0x40] sm:$0xff]  ;;  %v69_v20 = vld [vmem:[#allocation5 + $0x50] sm:$0xff] }
  0x2c   :  { %488 = vmatpush1.bf16.msra.mxu0 %v487_v8  ;;  %v553_v17 = vpack.c.bf16 %v74_v15, %v70_v14  ;;  %v71_v19 = vld [vmem:[#allocation5 + $0x60] sm:$0xff]  ;;  %v73_v22 = vld [vmem:[#allocation5 + $0x70] sm:$0xff]  ;;  %v76_v23 = vld [vmem:[#allocation5 + $0x88] sm:$0xff] }
  0x2d   :  { %552 = vmatpush1.bf16.msra.mxu1 %v551_v12  ;;  %v491_v21 = vpack.c.bf16 %v71_v19, %v67_v18  ;;  %v80_v24 = vld [vmem:[#allocation5 + $0xa8] sm:$0xff]  ;;  %490 = vmatprep.subr.bf16.mxu0 %v489_v16  ;;  %v555_v25 = vpack.c.bf16 %v73_v22, %v69_v20  ;;  %v78_v27 = vld [vmem:[#allocation5 + $0x98] sm:$0xff]  ;;  %v75_v29 = vld [vmem:[#allocation5 + $0x80] sm:$0xff] }
  0x2e   :  { %554 = vmatprep.subr.bf16.mxu1 %v553_v17  ;;  %v493_v26 = vpack.c.bf16 %v80_v24, %v76_v23  ;;  %v82_v28 = vld [vmem:[#allocation5 + $0xb8] sm:$0xff]  ;;  %v79_v31 = vld [vmem:[#allocation5 + $0xa0] sm:$0xff]  ;;  %v77_v32 = vld [vmem:[#allocation5 + $0x90] sm:$0xff] }
  0x2f   :  { %v557_v30 = vpack.c.bf16 %v82_v28, %v78_v27  ;;  %v81_v33 = vld [vmem:[#allocation5 + $0xb0] sm:$0xff]  ;;  %v495_v34 = vpack.c.bf16 %v79_v31, %v75_v29  ;;  %v84_v35 = vld [vmem:[#allocation5 + $0xc8] sm:$0xff]  ;;  %v86_v37 = vld [vmem:[#allocation5 + $0xd8] sm:$0xff] }
  0x30   :  { %492 = vmatpush1.bf16.msra.mxu0 %v491_v21  ;;  %v88_v36 = vld [vmem:[#allocation5 + $0xe8] sm:$0xff]  ;;  %v559_v38 = vpack.c.bf16 %v81_v33, %v77_v32  ;;  %v90_v40 = vld [vmem:[#allocation5 + $0xf8] sm:$0xff]  ;;  %v83_v41 = vld [vmem:[#allocation5 + $0xc0] sm:$0xff] }
  0x31   :  { %556 = vmatpush1.bf16.msra.mxu1 %v555_v25  ;;  %494 = vmatprep.subr.bf16.mxu0 %v493_v26  ;;  %v497_v39 = vpack.c.bf16 %v88_v36, %v84_v35  ;;  %v87_v42 = vld [vmem:[#allocation5 + $0xe0] sm:$0xff]  ;;  %v561_v43 = vpack.c.bf16 %v90_v40, %v86_v37  ;;  %v85_v44 = vld [vmem:[#allocation5 + $0xd0] sm:$0xff]  ;;  %v92_v46 = vld [vmem:[#allocation5 + $0x108] sm:$0xff] }
  0x32   :  { %558 = vmatprep.subr.bf16.mxu1 %v557_v30  ;;  %v89_v45 = vld [vmem:[#allocation5 + $0xf0] sm:$0xff]  ;;  %v96_v47 = vld [vmem:[#allocation5 + $0x128] sm:$0xff]  ;;  %v94_v48 = vld [vmem:[#allocation5 + $0x118] sm:$0xff]  ;;  %v499_v50 = vpack.c.bf16 %v87_v42, %v83_v41 }
  0x33   :  { %v98_v49 = vld [vmem:[#allocation5 + $0x138] sm:$0xff]  ;;  %v563_v51 = vpack.c.bf16 %v89_v45, %v85_v44  ;;  %v501_v52 = vpack.c.bf16 %v96_v47, %v92_v46  ;;  %v91_v53 = vld [vmem:[#allocation5 + $0x100] sm:$0xff]  ;;  %v93_v55 = vld [vmem:[#allocation5 + $0x110] sm:$0xff] }
  0x34   :  { %496 = vmatpush1.bf16.msra.mxu0 %v495_v34  ;;  %v95_v54 = vld [vmem:[#allocation5 + $0x120] sm:$0xff]  ;;  %v565_v56 = vpack.c.bf16 %v98_v49, %v94_v48  ;;  %v97_v57 = vld [vmem:[#allocation5 + $0x130] sm:$0xff]  ;;  %v100_v58 = vld [vmem:[#allocation5 + $0x148] sm:$0xff] }
  0x35   :  { %560 = vmatpush1.bf16.msra.mxu1 %v559_v38  ;;  %498 = vmatprep.subr.bf16.mxu0 %v497_v39  ;;  %v104_v59 = vld [vmem:[#allocation5 + $0x168] sm:$0xff]  ;;  %v102_v60 = vld [vmem:[#allocation5 + $0x158] sm:$0xff]  ;;  %v503_v62 = vpack.c.bf16 %v95_v54, %v91_v53  ;;  %v567_v63 = vpack.c.bf16 %v97_v57, %v93_v55  ;;  %v99_v1 = vld [vmem:[#allocation5 + $0x140] sm:$0xff] }
  0x36   :  { %562 = vmatprep.subr.bf16.mxu1 %v561_v43  ;;  %v106_v61 = vld [vmem:[#allocation5 + $0x178] sm:$0xff]  ;;  %v505_v0 = vpack.c.bf16 %v104_v59, %v100_v58  ;;  %v103_v2 = vld [vmem:[#allocation5 + $0x160] sm:$0xff]  ;;  %v101_v3 = vld [vmem:[#allocation5 + $0x150] sm:$0xff] }
  0x37   :  { %v569_v4 = vpack.c.bf16 %v106_v61, %v102_v60  ;;  %v105_v5 = vld [vmem:[#allocation5 + $0x170] sm:$0xff]  ;;  %v108_v6 = vld [vmem:[#allocation5 + $0x188] sm:$0xff]  ;;  %v110_v8 = vld [vmem:[#allocation5 + $0x198] sm:$0xff]  ;;  %v507_v10 = vpack.c.bf16 %v103_v2, %v99_v1 }
  0x38   :  { %500 = vmatpush1.bf16.msra.mxu0 %v499_v50  ;;  %v112_v7 = vld [vmem:[#allocation5 + $0x1a8] sm:$0xff]  ;;  %v114_v9 = vld [vmem:[#allocation5 + $0x1b8] sm:$0xff]  ;;  %v571_v11 = vpack.c.bf16 %v105_v5, %v101_v3  ;;  %v107_v13 = vld [vmem:[#allocation5 + $0x180] sm:$0xff] }
  0x39   :  { %564 = vmatpush1.bf16.msra.mxu1 %v563_v51  ;;  %502 = vmatprep.subr.bf16.mxu0 %v501_v52  ;;  %v509_v12 = vpack.c.bf16 %v112_v7, %v108_v6  ;;  %v111_v14 = vld [vmem:[#allocation5 + $0x1a0] sm:$0xff]  ;;  %v109_v15 = vld [vmem:[#allocation5 + $0x190] sm:$0xff]  ;;  %v573_v16 = vpack.c.bf16 %v114_v9, %v110_v8  ;;  %v116_v18 = vld [vmem:[#allocation5 + $0x1c8] sm:$0xff] }
  0x3a   :  { %566 = vmatprep.subr.bf16.mxu1 %v565_v56  ;;  %v113_v17 = vld [vmem:[#allocation5 + $0x1b0] sm:$0xff]  ;;  %v120_v19 = vld [vmem:[#allocation5 + $0x1e8] sm:$0xff]  ;;  %v118_v20 = vld [vmem:[#allocation5 + $0x1d8] sm:$0xff]  ;;  %v511_v22 = vpack.c.bf16 %v111_v14, %v107_v13 }
  0x3b   :  { %v122_v21 = vld [vmem:[#allocation5 + $0x1f8] sm:$0xff]  ;;  %v575_v23 = vpack.c.bf16 %v113_v17, %v109_v15  ;;  %v513_v24 = vpack.c.bf16 %v120_v19, %v116_v18  ;;  %v115_v25 = vld [vmem:[#allocation5 + $0x1c0] sm:$0xff]  ;;  %v117_v27 = vld [vmem:[#allocation5 + $0x1d0] sm:$0xff] }
  0x3c   :  { %504 = vmatpush1.bf16.msra.mxu0 %v503_v62  ;;  %v119_v26 = vld [vmem:[#allocation5 + $0x1e0] sm:$0xff]  ;;  %v577_v28 = vpack.c.bf16 %v122_v21, %v118_v20  ;;  %v121_v29 = vld [vmem:[#allocation5 + $0x1f0] sm:$0xff]  ;;  %v124_v30 = vld [vmem:[#allocation5 + $0x208] sm:$0xff] }
  0x3d   :  { %568 = vmatpush1.bf16.msra.mxu1 %v567_v63  ;;  %506 = vmatprep.subr.bf16.mxu0 %v505_v0  ;;  %v128_v31 = vld [vmem:[#allocation5 + $0x228] sm:$0xff]  ;;  %v126_v32 = vld [vmem:[#allocation5 + $0x218] sm:$0xff]  ;;  %v515_v34 = vpack.c.bf16 %v119_v26, %v115_v25  ;;  %v579_v35 = vpack.c.bf16 %v121_v29, %v117_v27  ;;  %v123_v37 = vld [vmem:[#allocation5 + $0x200] sm:$0xff] }
  0x3e   :  { %570 = vmatprep.subr.bf16.mxu1 %v569_v4  ;;  %v130_v33 = vld [vmem:[#allocation5 + $0x238] sm:$0xff]  ;;  %v517_v36 = vpack.c.bf16 %v128_v31, %v124_v30  ;;  %v127_v38 = vld [vmem:[#allocation5 + $0x220] sm:$0xff]  ;;  %v125_v39 = vld [vmem:[#allocation5 + $0x210] sm:$0xff] }
  0x3f   :  { %v581_v40 = vpack.c.bf16 %v130_v33, %v126_v32  ;;  %v129_v41 = vld [vmem:[#allocation5 + $0x230] sm:$0xff]  ;;  %v132_v42 = vld [vmem:[#allocation5 + $0x248] sm:$0xff]  ;;  %v134_v44 = vld [vmem:[#allocation5 + $0x258] sm:$0xff]  ;;  %v519_v46 = vpack.c.bf16 %v127_v38, %v123_v37 }
  0x40   :  { %508 = vmatpush1.bf16.msra.mxu0 %v507_v10  ;;  %v136_v43 = vld [vmem:[#allocation5 + $0x268] sm:$0xff]  ;;  %v138_v45 = vld [vmem:[#allocation5 + $0x278] sm:$0xff]  ;;  %v583_v47 = vpack.c.bf16 %v129_v41, %v125_v39  ;;  %v131_v49 = vld [vmem:[#allocation5 + $0x240] sm:$0xff] }
  0x41   :  { %572 = vmatpush1.bf16.msra.mxu1 %v571_v11  ;;  %510 = vmatprep.subr.bf16.mxu0 %v509_v12  ;;  %v521_v48 = vpack.c.bf16 %v136_v43, %v132_v42  ;;  %v135_v50 = vld [vmem:[#allocation5 + $0x260] sm:$0xff]  ;;  %v133_v51 = vld [vmem:[#allocation5 + $0x250] sm:$0xff]  ;;  %v585_v52 = vpack.c.bf16 %v138_v45, %v134_v44  ;;  %v140_v54 = vld [vmem:[#allocation5 + $0x288] sm:$0xff] }
  0x42   :  { %574 = vmatprep.subr.bf16.mxu1 %v573_v16  ;;  %v137_v53 = vld [vmem:[#allocation5 + $0x270] sm:$0xff]  ;;  %v144_v55 = vld [vmem:[#allocation5 + $0x2a8] sm:$0xff]  ;;  %v142_v56 = vld [vmem:[#allocation5 + $0x298] sm:$0xff]  ;;  %v523_v58 = vpack.c.bf16 %v135_v50, %v131_v49 }
  0x43   :  { %v146_v57 = vld [vmem:[#allocation5 + $0x2b8] sm:$0xff]  ;;  %v587_v59 = vpack.c.bf16 %v137_v53, %v133_v51  ;;  %v525_v60 = vpack.c.bf16 %v144_v55, %v140_v54  ;;  %v139_v61 = vld [vmem:[#allocation5 + $0x280] sm:$0xff]  ;;  %v141_v63 = vld [vmem:[#allocation5 + $0x290] sm:$0xff] }
  0x44   :  { %512 = vmatpush1.bf16.msra.mxu0 %v511_v22  ;;  %v143_v62 = vld [vmem:[#allocation5 + $0x2a0] sm:$0xff]  ;;  %v589_v0 = vpack.c.bf16 %v146_v57, %v142_v56  ;;  %v145_v1 = vld [vmem:[#allocation5 + $0x2b0] sm:$0xff]  ;;  %v148_v2 = vld [vmem:[#allocation5 + $0x2c8] sm:$0xff] }
  0x45   :  { %576 = vmatpush1.bf16.msra.mxu1 %v575_v23  ;;  %514 = vmatprep.subr.bf16.mxu0 %v513_v24  ;;  %v152_v3 = vld [vmem:[#allocation5 + $0x2e8] sm:$0xff]  ;;  %v150_v4 = vld [vmem:[#allocation5 + $0x2d8] sm:$0xff]  ;;  %v527_v6 = vpack.c.bf16 %v143_v62, %v139_v61  ;;  %v147_v7 = vld [vmem:[#allocation5 + $0x2c0] sm:$0xff]  ;;  %v591_v8 = vpack.c.bf16 %v145_v1, %v141_v63 }
  0x46   :  { %578 = vmatprep.subr.bf16.mxu1 %v577_v28  ;;  %v154_v5 = vld [vmem:[#allocation5 + $0x2f8] sm:$0xff]  ;;  %v529_v9 = vpack.c.bf16 %v152_v3, %v148_v2  ;;  %v151_v10 = vld [vmem:[#allocation5 + $0x2e0] sm:$0xff]  ;;  %v149_v11 = vld [vmem:[#allocation5 + $0x2d0] sm:$0xff] }
  0x47   :  { %v153_v12 = vld [vmem:[#allocation5 + $0x2f0] sm:$0xff]  ;;  %v593_v13 = vpack.c.bf16 %v154_v5, %v150_v4  ;;  %v156_v14 = vld [vmem:[#allocation5 + $0x308] sm:$0xff]  ;;  %v158_v17 = vld [vmem:[#allocation5 + $0x318] sm:$0xff]  ;;  %v531_v19 = vpack.c.bf16 %v151_v10, %v147_v7 }
  0x48   :  { %516 = vmatpush1.bf16.msra.mxu0 %v515_v34  ;;  %v160_v15 = vld [vmem:[#allocation5 + $0x328] sm:$0xff]  ;;  %v162_v18 = vld [vmem:[#allocation5 + $0x338] sm:$0xff]  ;;  %v595_v20 = vpack.c.bf16 %v153_v12, %v149_v11  ;;  %v155_v22 = vld [vmem:[#allocation5 + $0x300] sm:$0xff] }
  0x49   :  { %580 = vmatpush1.bf16.msra.mxu1 %v579_v35  ;;  %518 = vmatprep.subr.bf16.mxu0 %v517_v36  ;;  %v44_v16 = vld [vmem:[#allocation2 + $0x8] sm:$0xff]  ;;  %v533_v21 = vpack.c.bf16 %v160_v15, %v156_v14  ;;  %v159_v23 = vld [vmem:[#allocation5 + $0x320] sm:$0xff]  ;;  %v157_v24 = vld [vmem:[#allocation5 + $0x310] sm:$0xff]  ;;  %v597_v25 = vpack.c.bf16 %v162_v18, %v158_v17 }
  0x4a   :  { %582 = vmatprep.subr.bf16.mxu1 %v581_v40  ;;  %273 = vmatprep.mubr.f32.mxu0 %v44_v16  ;;  %v161_v26 = vld [vmem:[#allocation5 + $0x330] sm:$0xff]  ;;  %v164_v27 = vld [vmem:[#allocation5 + $0x348] sm:$0xff]  ;;  %v166_v29 = vld [vmem:[#allocation5 + $0x358] sm:$0xff]  ;;  %v535_v31 = vpack.c.bf16 %v159_v23, %v155_v22 }
  0x4b   :  { %386 = vmatprep.mubr.f32.mxu1 %v44_v16  ;;  %v168_v28 = vld [vmem:[#allocation5 + $0x368] sm:$0xff]  ;;  %v170_v30 = vld [vmem:[#allocation5 + $0x378] sm:$0xff]  ;;  %v599_v32 = vpack.c.bf16 %v161_v26, %v157_v24  ;;  %v163_v34 = vld [vmem:[#allocation5 + $0x340] sm:$0xff]  ;;  %v189_v16 = vlaneseq }
  0x4c   :  { %520 = vmatpush1.bf16.msra.mxu0 %v519_v46  ;;  %v537_v33 = vpack.c.bf16 %v168_v28, %v164_v27  ;;  %v167_v35 = vld [vmem:[#allocation5 + $0x360] sm:$0xff]  ;;  %v165_v36 = vld [vmem:[#allocation5 + $0x350] sm:$0xff]  ;;  %v601_v37 = vpack.c.bf16 %v170_v30, %v166_v29  ;;  %v172_v39 = vld [vmem:[#allocation5 + $0x388] sm:$0xff] }
  0x4d   :  { %584 = vmatpush1.bf16.msra.mxu1 %v583_v47  ;;  %522 = vmatprep.subr.bf16.mxu0 %v521_v48  ;;  %v169_v38 = vld [vmem:[#allocation5 + $0x370] sm:$0xff]  ;;  %v176_v40 = vld [vmem:[#allocation5 + $0x3a8] sm:$0xff]  ;;  %v174_v41 = vld [vmem:[#allocation5 + $0x398] sm:$0xff]  ;;  %v539_v43 = vpack.c.bf16 %v167_v35, %v163_v34  ;;  %v190_v17 = vshrl.u32 %v189_v16, 7 }
  0x4e   :  { %586 = vmatprep.subr.bf16.mxu1 %v585_v52  ;;  %v178_v42 = vld [vmem:[#allocation5 + $0x3b8] sm:$0xff]  ;;  %v603_v44 = vpack.c.bf16 %v169_v38, %v165_v36  ;;  %v541_v45 = vpack.c.bf16 %v176_v40, %v172_v39  ;;  %v171_v46 = vld [vmem:[#allocation5 + $0x380] sm:$0xff]  ;;  %v173_v48 = vld [vmem:[#allocation5 + $0x390] sm:$0xff] }
  0x4f   :  { %v175_v47 = vld [vmem:[#allocation5 + $0x3a0] sm:$0xff]  ;;  %v605_v49 = vpack.c.bf16 %v178_v42, %v174_v41  ;;  %v177_v50 = vld [vmem:[#allocation5 + $0x3b0] sm:$0xff]  ;;  %v180_v51 = vld [vmem:[#allocation5 + $0x3c8] sm:$0xff]  ;;  %v191_v18 = vsub.s32 0, %v190_v17  ;;  %v203_v22 = vsub.s32 3, %v190_v17 }
  0x50   :  { %524 = vmatpush1.bf16.msra.mxu0 %v523_v58  ;;  %v184_v52 = vld [vmem:[#allocation5 + $0x3e8] sm:$0xff]  ;;  %v182_v53 = vld [vmem:[#allocation5 + $0x3d8] sm:$0xff]  ;;  %v543_v55 = vpack.c.bf16 %v175_v47, %v171_v46  ;;  %v607_v56 = vpack.c.bf16 %v177_v50, %v173_v48  ;;  %v179_v58 = vld [vmem:[#allocation5 + $0x3c0] sm:$0xff] }
  0x51   :  { %588 = vmatpush1.bf16.msra.mxu1 %v587_v59  ;;  %526 = vmatprep.subr.bf16.mxu0 %v525_v60  ;;  %v186_v54 = vld [vmem:[#allocation5 + $0x3f8] sm:$0xff]  ;;  %v545_v57 = vpack.c.bf16 %v184_v52, %v180_v51  ;;  %v183_v59 = vld [vmem:[#allocation5 + $0x3e0] sm:$0xff]  ;;  %v181_v61 = vld [vmem:[#allocation5 + $0x3d0] sm:$0xff] }
  0x52   :  { %590 = vmatprep.subr.bf16.mxu1 %v589_v0  ;;  %v609_v60 = vpack.c.bf16 %v186_v54, %v182_v53  ;;  %v185_v62 = vld [vmem:[#allocation5 + $0x3f0] sm:$0xff]  ;;  %v547_v63 = vpack.c.bf16 %v183_v59, %v179_v58  ;;  %v43_v1 = vld [vmem:[#allocation2] sm:$0xff]  ;;  %v46_v2 = vld [vmem:[#allocation2 + $0x18] sm:$0xff] }
  0x53   :  { %v611_v0 = vpack.c.bf16 %v185_v62, %v181_v61  ;;  %v45_v3 = vld [vmem:[#allocation2 + $0x10] sm:$0xff]  ;;  %v48_v4 = vld [vmem:[#allocation2 + $0x28] sm:$0xff]  ;;  %v47_v5 = vld [vmem:[#allocation2 + $0x20] sm:$0xff] }
  0x54   :  { %528 = vmatpush1.bf16.msra.mxu0 %v527_v6  ;;  %v50_v6 = vld [vmem:[#allocation2 + $0x38] sm:$0xff]  ;;  %v49_v7 = vld [vmem:[#allocation2 + $0x30] sm:$0xff]  ;;  %v56_v12 = vld [vmem:[#allocation2 + $0x68] sm:$0xff] }
  0x55   :  { %592 = vmatpush1.bf16.msra.mxu1 %v591_v8  ;;  %530 = vmatprep.subr.bf16.mxu0 %v529_v9  ;;  %v52_v8 = vld [vmem:[#allocation2 + $0x48] sm:$0xff]  ;;  %v51_v9 = vld [vmem:[#allocation2 + $0x40] sm:$0xff]  ;;  %v54_v10 = vld [vmem:[#allocation2 + $0x58] sm:$0xff] }
  0x56   :  { %594 = vmatprep.subr.bf16.mxu1 %v593_v13  ;;  %v53_v11 = vld [vmem:[#allocation2 + $0x50] sm:$0xff]  ;;  %v55_v13 = vld [vmem:[#allocation2 + $0x60] sm:$0xff]  ;;  %v58_v14 = vld [vmem:[#allocation2 + $0x78] sm:$0xff] }
  0x57   :  { %v57_v15 = vld [vmem:[#allocation2 + $0x70] sm:$0xff] }
  0x58   :  { %532 = vmatpush1.bf16.msra.mxu0 %v531_v19  ;;  %v187_v19 = vld [vmem:[%s806_s2] sm:$0xf]  ;;  %s698_s2 = smov [#allocation7]  }
  0x59   :  { %596 = vmatpush1.bf16.msra.mxu1 %v595_v20  ;;  %534 = vmatprep.subr.bf16.mxu0 %v533_v21  ;;  %v199_v20 = vsub.s32 2, %v190_v17  ;;  %v195_v21 = vsub.s32 1, %v190_v17  ;;  %v749_v23 = vrot.slane %v187_v19, %v191_v18  ;;  %v755_v26 = vrot.slane %v187_v19, %v203_v22  ;;  %s472_s13 = sshll.u32 %s698_s2, 4  ;;  %s473_s13 = int_to_ptr.vmem [resolvable:$true] %s472_s13 }
  0x5a   :  { %598 = vmatprep.subr.bf16.mxu1 %v597_v25  ;;  %s664_s14 = scalar_lea.vmem %s473_s13, 4096  ;;  %p669_p3 = scmp.lt.s32.totalorder %s473_s13, %s473_s13 }
  0x5b   :  { %v751_v24 = vrot.slane %v187_v19, %v199_v20  ;;  %v753_v25 = vrot.slane %v187_v19, %v195_v21  ;;  %p665_p2 = scmp.ne.s32.totalorder %s473_s13, %s664_s14  ;;  %p670_p4 = scmp.lt.s32.totalorder %s664_s14, %s664_s14 }
  0x5c   :  { %536 = vmatpush1.bf16.msra.mxu0 %v535_v31 }
  0x5d   :  { %600 = vmatpush1.bf16.msra.mxu1 %v599_v32  ;;  %538 = vmatprep.subr.bf16.mxu0 %v537_v33  ;;  %p671_p5 = por %p670_p4, %p669_p3 }
  0x5e   :  { %602 = vmatprep.subr.bf16.mxu1 %v601_v37 }
  0x5f   :  { %p672_p6 = pnand %p671_p5, %p665_p2 }
  0x60   :  { %540 = vmatpush1.bf16.msra.mxu0 %v539_v43 }
  0x61   :  { %604 = vmatpush1.bf16.msra.mxu1 %v603_v44  ;;  %542 = vmatprep.subr.bf16.mxu0 %v541_v45 }
  0x62   :  { %606 = vmatprep.subr.bf16.mxu1 %v605_v49 }
  0x64   :  { %544 = vmatpush1.bf16.msra.mxu0 %v543_v55 }
  0x65   :  { %608 = vmatpush1.bf16.msra.mxu1 %v607_v56  ;;  %546 = vmatprep.subr.bf16.mxu0 %v545_v57 }
  0x66   :  { %610 = vmatprep.subr.bf16.mxu1 %v609_v60 }
  0x68   :  { %548 = vmatpush1.bf16.msra.mxu0 %v547_v63 }
  0x69   :  { %612 = vmatpush1.bf16.msra.mxu1 %v611_v0 }
  0x6b   :  { %274 = vmatmul.mubr.f32.vlgmr.msra.gmra.mrb[0].mxu0 %v43_v1 }
  0x6c   :  { %387 = vmatmul.mubr.f32.vlgmr.msra.gmra.mrb[0].mxu1 %v43_v1  ;;  %279 = vmatprep.mubr.f32.mxu0 %v46_v2 }
  0x6d   :  { %392 = vmatprep.mubr.f32.mxu1 %v46_v2 }
  0x6f   :  { %280 = vmatmul.mubr.f32.gmra.mrb[2].mxu0 %v45_v3 }
  0x70   :  { %393 = vmatmul.mubr.f32.gmra.mrb[2].mxu1 %v45_v3  ;;  %285 = vmatprep.mubr.f32.mxu0 %v48_v4 }
  0x71   :  { %398 = vmatprep.mubr.f32.mxu1 %v48_v4 }
  0x73   :  { %286 = vmatmul.mubr.f32.gmra.mrb[4].mxu0 %v47_v5 }
  0x74   :  { %399 = vmatmul.mubr.f32.gmra.mrb[4].mxu1 %v47_v5  ;;  %291 = vmatprep.mubr.f32.mxu0 %v50_v6 }
  0x75   :  { %404 = vmatprep.mubr.f32.mxu1 %v50_v6 }
  0x77   :  { %292 = vmatmul.mubr.f32.gmra.mrb[6].mxu0 %v49_v7 }
  0x78   :  { %405 = vmatmul.mubr.f32.gmra.mrb[6].mxu1 %v49_v7  ;;  %297 = vmatprep.mubr.f32.mxu0 %v52_v8 }
  0x79   :  { %410 = vmatprep.mubr.f32.mxu1 %v52_v8 }
  0x7b   :  { %298 = vmatmul.mubr.f32.gmra.mrb[8].mxu0 %v51_v9 }
  0x7c   :  { %411 = vmatmul.mubr.f32.gmra.mrb[8].mxu1 %v51_v9  ;;  %303 = vmatprep.mubr.f32.mxu0 %v54_v10 }
  0x7d   :  { %416 = vmatprep.mubr.f32.mxu1 %v54_v10 }
  0x7f   :  { %304 = vmatmul.mubr.f32.gmra.mrb[10].mxu0 %v53_v11 }
  0x80   :  { %417 = vmatmul.mubr.f32.gmra.mrb[10].mxu1 %v53_v11  ;;  %309 = vmatprep.mubr.f32.mxu0 %v56_v12 }
  0x81   :  { %422 = vmatprep.mubr.f32.mxu1 %v56_v12 }
  0x83   :  { %310 = vmatmul.mubr.f32.gmra.mrb[12].mxu0 %v55_v13 }
  0x84   :  { %423 = vmatmul.mubr.f32.gmra.mrb[12].mxu1 %v55_v13  ;;  %315 = vmatprep.mubr.f32.mxu0 %v58_v14 }
  0x85   :  { %428 = vmatprep.mubr.f32.mxu1 %v58_v14 }
  0x87   :  { %316 = vmatmul.mubr.f32.gmra.mrb[14].mxu0 %v57_v15 }
  0x88   :  { %429 = vmatmul.mubr.f32.gmra.mrb[14].mxu1 %v57_v15 }
 0x13e   :  { %v275_v27 = vpop.f32.mrb[0].mxu0 }
 0x13f   :  { %v276_v28 = vadd.f32 %v275_v27, %v749_v23  ;;  %v388_v29 = vpop.f32.mrb[0].mxu1  ;;  %v277_v30 = vpop.f32.mrb[1].mxu0 }
 0x140   :  { %v389_v31 = vadd.f32 %v388_v29, %v751_v24  ;;  %v278_v32 = vadd.f32 %v277_v30, %v753_v25  ;;  %v390_v33 = vpop.f32.mrb[1].mxu1 }
 0x141   :  { %435 = vst [vmem:[#allocation7] sm:$0xff] %v276_v28  ;;  %v391_v34 = vadd.f32 %v390_v33, %v755_v26 }
 0x142   :  { %437 = vst [vmem:[#allocation7 + $0x10] sm:$0xff] %v389_v31  ;;  %436 = vst [vmem:[#allocation7 + $0x8] sm:$0xff] %v278_v32  ;;  %v281_v35 = vpop.f32.mrb[2].mxu0 }
 0x143   :  { %438 = vst [vmem:[#allocation7 + $0x18] sm:$0xff] %v391_v34  ;;  %v282_v36 = vadd.f32 %v281_v35, %v749_v23  ;;  %v394_v37 = vpop.f32.mrb[2].mxu1  ;;  %v283_v38 = vpop.f32.mrb[3].mxu0 }
 0x144   :  { %v395_v39 = vadd.f32 %v394_v37, %v751_v24  ;;  %v284_v40 = vadd.f32 %v283_v38, %v753_v25  ;;  %v396_v41 = vpop.f32.mrb[3].mxu1 }
 0x145   :  { %439 = vst [vmem:[#allocation7 + $0x20] sm:$0xff] %v282_v36  ;;  %v397_v42 = vadd.f32 %v396_v41, %v755_v26 }
 0x146   :  { %441 = vst [vmem:[#allocation7 + $0x30] sm:$0xff] %v395_v39  ;;  %440 = vst [vmem:[#allocation7 + $0x28] sm:$0xff] %v284_v40  ;;  %v287_v43 = vpop.f32.mrb[4].mxu0 }
 0x147   :  { %442 = vst [vmem:[#allocation7 + $0x38] sm:$0xff] %v397_v42  ;;  %v288_v44 = vadd.f32 %v287_v43, %v749_v23  ;;  %v400_v45 = vpop.f32.mrb[4].mxu1  ;;  %v289_v46 = vpop.f32.mrb[5].mxu0 }
 0x148   :  { %v401_v47 = vadd.f32 %v400_v45, %v751_v24  ;;  %v290_v48 = vadd.f32 %v289_v46, %v753_v25  ;;  %v402_v49 = vpop.f32.mrb[5].mxu1 }
 0x149   :  { %443 = vst [vmem:[#allocation7 + $0x40] sm:$0xff] %v288_v44  ;;  %v403_v50 = vadd.f32 %v402_v49, %v755_v26 }
 0x14a   :  { %445 = vst [vmem:[#allocation7 + $0x50] sm:$0xff] %v401_v47  ;;  %444 = vst [vmem:[#allocation7 + $0x48] sm:$0xff] %v290_v48  ;;  %v293_v51 = vpop.f32.mrb[6].mxu0 }
 0x14b   :  { %446 = vst [vmem:[#allocation7 + $0x58] sm:$0xff] %v403_v50  ;;  %v294_v52 = vadd.f32 %v293_v51, %v749_v23  ;;  %v406_v53 = vpop.f32.mrb[6].mxu1  ;;  %v295_v54 = vpop.f32.mrb[7].mxu0 }
 0x14c   :  { %v407_v55 = vadd.f32 %v406_v53, %v751_v24  ;;  %v296_v56 = vadd.f32 %v295_v54, %v753_v25  ;;  %v408_v57 = vpop.f32.mrb[7].mxu1 }
 0x14d   :  { %447 = vst [vmem:[#allocation7 + $0x60] sm:$0xff] %v294_v52  ;;  %v409_v58 = vadd.f32 %v408_v57, %v755_v26 }
 0x14e   :  { %449 = vst [vmem:[#allocation7 + $0x70] sm:$0xff] %v407_v55  ;;  %448 = vst [vmem:[#allocation7 + $0x68] sm:$0xff] %v296_v56  ;;  %v299_v59 = vpop.f32.mrb[8].mxu0 }
 0x14f   :  { %450 = vst [vmem:[#allocation7 + $0x78] sm:$0xff] %v409_v58  ;;  %v300_v60 = vadd.f32 %v299_v59, %v749_v23  ;;  %v412_v61 = vpop.f32.mrb[8].mxu1  ;;  %v301_v62 = vpop.f32.mrb[9].mxu0 }
 0x150   :  { %v413_v63 = vadd.f32 %v412_v61, %v751_v24  ;;  %v302_v0 = vadd.f32 %v301_v62, %v753_v25  ;;  %v414_v1 = vpop.f32.mrb[9].mxu1 }
 0x151   :  { %451 = vst [vmem:[#allocation7 + $0x80] sm:$0xff] %v300_v60  ;;  %v415_v2 = vadd.f32 %v414_v1, %v755_v26 }
 0x152   :  { %453 = vst [vmem:[#allocation7 + $0x90] sm:$0xff] %v413_v63  ;;  %452 = vst [vmem:[#allocation7 + $0x88] sm:$0xff] %v302_v0  ;;  %v305_v3 = vpop.f32.mrb[10].mxu0 }
 0x153   :  { %454 = vst [vmem:[#allocation7 + $0x98] sm:$0xff] %v415_v2  ;;  %v306_v4 = vadd.f32 %v305_v3, %v749_v23  ;;  %v418_v5 = vpop.f32.mrb[10].mxu1  ;;  %v307_v6 = vpop.f32.mrb[11].mxu0 }
 0x154   :  { %v419_v7 = vadd.f32 %v418_v5, %v751_v24  ;;  %v308_v8 = vadd.f32 %v307_v6, %v753_v25  ;;  %v420_v9 = vpop.f32.mrb[11].mxu1 }
 0x155   :  { %455 = vst [vmem:[#allocation7 + $0xa0] sm:$0xff] %v306_v4  ;;  %v421_v10 = vadd.f32 %v420_v9, %v755_v26 }
 0x156   :  { %457 = vst [vmem:[#allocation7 + $0xb0] sm:$0xff] %v419_v7  ;;  %456 = vst [vmem:[#allocation7 + $0xa8] sm:$0xff] %v308_v8  ;;  %v311_v11 = vpop.f32.mrb[12].mxu0 }
 0x157   :  { %458 = vst [vmem:[#allocation7 + $0xb8] sm:$0xff] %v421_v10  ;;  %v312_v12 = vadd.f32 %v311_v11, %v749_v23  ;;  %v424_v13 = vpop.f32.mrb[12].mxu1  ;;  %v313_v14 = vpop.f32.mrb[13].mxu0 }
 0x158   :  { %v425_v15 = vadd.f32 %v424_v13, %v751_v24  ;;  %v314_v16 = vadd.f32 %v313_v14, %v753_v25  ;;  %v426_v17 = vpop.f32.mrb[13].mxu1 }
 0x159   :  { %459 = vst [vmem:[#allocation7 + $0xc0] sm:$0xff] %v312_v12  ;;  %v427_v18 = vadd.f32 %v426_v17, %v755_v26 }
 0x15a   :  { %461 = vst [vmem:[#allocation7 + $0xd0] sm:$0xff] %v425_v15  ;;  %460 = vst [vmem:[#allocation7 + $0xc8] sm:$0xff] %v314_v16  ;;  %v317_v19 = vpop.f32.mrb[14].mxu0 }
 0x15b   :  { %462 = vst [vmem:[#allocation7 + $0xd8] sm:$0xff] %v427_v18  ;;  %v318_v20 = vadd.f32 %v317_v19, %v749_v23  ;;  %v430_v21 = vpop.f32.mrb[14].mxu1  ;;  %v319_v22 = vpop.f32.mrb[15].mxu0 }
 0x15c   :  { %v431_v27 = vadd.f32 %v430_v21, %v751_v24  ;;  %v320_v28 = vadd.f32 %v319_v22, %v753_v25  ;;  %v432_v29 = vpop.f32.mrb[15].mxu1 }
 0x15d   :  { %463 = vst [vmem:[#allocation7 + $0xe0] sm:$0xff] %v318_v20  ;;  %v433_v30 = vadd.f32 %v432_v29, %v755_v26 }
 0x15e   :  { %465 = vst [vmem:[#allocation7 + $0xf0] sm:$0xff] %v431_v27  ;;  %464 = vst [vmem:[#allocation7 + $0xe8] sm:$0xff] %v320_v28 }
 0x15f   :  { %466 = vst [vmem:[#allocation7 + $0xf8] sm:$0xff] %v433_v30 }
 0x160   :  { %675 = shalt.err (!%p672_p6)
}
 0x161   :  { %s676_s17 = scalar_lea.hbm %s807_s3, 4096 }
 0x162   :  { %p677_p7 = scmp.ne.s32.totalorder %s807_s3, %s676_s17  ;;  %p680_p8 = scmp.lt.u32.totalorder %s676_s17, %s807_s3 }
 0x164   :  { %p682_p9 = pnand %p680_p8, %p677_p7 }
 0x166   :  { %685 = shalt.err (!%p682_p9)
}
 0x167   :  { %478 = dma.vmem_to_hbm [thread:$0]  %s473_s13, 4096, %s807_s3, [#allocation4], %s696_s0, %s696_s0, %s697_s9  }
 0x168   :  { %690 = dma.done.wait [#allocation4], 4096  }
 0x169   :  { %691 = vsyncadd [#allocation4], 4294963200 }
 0x16a   :  { %482 = vsyncpa [#allocation3], 1 }
 0x16b   :  { %483 = vsyncpa [#allocation6], 1 }
 0x16c   :  { %484 = vsyncpa [#allocation4], 1 }

</bundles_post_ra>
